<compile_context>
chip_gen: v6e
topology: v6e:2x2x1
jax: 0.10.0
libtpu: 0.0.40
codegen_flags: <defaults>
</compile_context>

<pallas_src>
import jax
import jax.numpy as jnp
from jax.experimental import pallas as pl
from jax.experimental.pallas import tpu as pltpu

_HIDDEN = 512
_LANE = 128
_SUBLANE = 8
_MAX_TM = 1024  # batch-tile cap
_MAX_TN = 512   # class-tile cap


def _round_up(x, m):
    return ((x + m - 1) // m) * m


def _cdiv(a, b):
    return (a + b - 1) // b


def _linear_kernel(x_ref, w_ref, b_ref, o_ref):
    # x_ref: (TM, 512)  w_ref: (512, TN)  b_ref: (1, TN)  o_ref: (TM, TN)
    acc = jnp.dot(x_ref[...], w_ref[...], preferred_element_type=jnp.float32)
    o_ref[...] = (acc + b_ref[...]).astype(o_ref.dtype)


def classify_logits(x, w, b, *, compute_dtype=None):
    """Pallas implementation of nn.Linear(512, num_classes).

    x: (B, 512) features (output of the extractor)
    w: (512, num_classes)   (transposed PyTorch weight)
    b: (num_classes,)
    compute_dtype: optional dtype (e.g. jnp.bfloat16) for x/w in the matmul;
      accumulation is always float32.
    returns: (B, num_classes) float32 logits
    """
    B, H = x.shape
    H2, C = w.shape
    assert H == H2 == _HIDDEN

    if compute_dtype is not None:
        x = x.astype(compute_dtype)
        w = w.astype(compute_dtype)
    in_itemsize = jnp.dtype(x.dtype).itemsize

    # Lane-dense output: pad class dim to a multiple of 128, tile at <= 512.
    C_pad = _round_up(C, _LANE)
    TN = min(C_pad, _MAX_TN)
    grid_c = _cdiv(C_pad, TN)

    # Batch tiling: x is NOT padded; the ragged last block is masked on store.
    if B < 64:
        TM = B  # single full-extent block (no (8,128) constraint: equals array dim)
    else:
        # Guarantee >= 2 grid steps so v7x shards the batch over both TensorCores.
        TM = min(_MAX_TM, _round_up(_cdiv(B, 2), _SUBLANE))
    grid_b = _cdiv(B, TM)

    w_p = w if C_pad == C else jnp.pad(w, ((0, 0), (0, C_pad - C)))
    b_p = b if C_pad == C else jnp.pad(b, (0, C_pad - C))
    b_p = b_p.reshape(1, C_pad).astype(jnp.float32)

    # VMEM budget (2 pipeline buffers per operand) + headroom; keeps us explicit
    # under v5e's 16 MiB scoped default and v7x's 64 MiB physical VMEM.
    vmem_bytes = (2 * TM * H * in_itemsize      # x tile, double-buffered
                  + 2 * H * TN * in_itemsize    # weight tile
                  + 2 * TN * 4                  # bias tile
                  + 2 * TM * TN * 4)            # output tile, double-buffered
    vmem_limit = int(min(64 * 1024 * 1024, max(2 * vmem_bytes, 16 * 1024 * 1024)))

    cost = pl.CostEstimate(
        flops=2 * B * H * C_pad,
        transcendentals=0,
        bytes_accessed=in_itemsize * (B * H + H * C_pad) + 4 * (B * C_pad + C_pad),
    )

    out = pl.pallas_call(
        _linear_kernel,
        out_shape=jax.ShapeDtypeStruct((B, C_pad), jnp.float32),
        grid_spec=pl.GridSpec(
            grid=(grid_b, grid_c),
            in_specs=[
                # x tile: pipelined over B, VMEM-resident across the inner class axis.
                pl.BlockSpec((TM, H), lambda i, j: (i, 0)),
                # weight / bias tiles: streamed over the class axis only.
                pl.BlockSpec((H, TN), lambda i, j: (0, j)),
                pl.BlockSpec((1, TN), lambda i, j: (0, j)),
            ],
            out_specs=pl.BlockSpec((TM, TN), lambda i, j: (i, j)),
        ),
        compiler_params=pltpu.CompilerParams(
            dimension_semantics=("parallel", "parallel"),
            vmem_limit_bytes=vmem_limit,
        ),
        cost_estimate=cost,
    )(x, w_p, b_p)

    return out if C_pad == C else out[:, :C]


def extractor(x):
    # Black-box backbone stand-in: identity on 512-d features.
    return x


def classify_forward(x, w, b, *, compute_dtype=None):
    feats = extractor(x)
    if feats is None:
        return None
    return classify_logits(feats, w, b, compute_dtype=compute_dtype)


if __name__ == "__main__":
    hidden = 512
    key = jax.random.PRNGKey(0)
    keys = jax.random.split(key, 9)
    bound = 1.0 / (hidden ** 0.5)  # PyTorch nn.Linear default init range

    # --- case 1: small head (C < 128, B < 64 -> single full-extent block) -----
    B1, C1 = 8, 10
    w1 = jax.random.uniform(keys[0], (hidden, C1), jnp.float32, -bound, bound)
    b1 = jax.random.uniform(keys[1], (C1,), jnp.float32, -bound, bound)
    x1 = jax.random.normal(keys[2], (B1, hidden), jnp.float32)
    out1 = jax.block_until_ready(classify_forward(x1, w1, b1))
    ref1 = x1 @ w1 + b1
    assert out1.shape == (B1, C1)
    assert jnp.allclose(out1, ref1, atol=1e-4, rtol=1e-4)

    # --- case 2: ragged batch + ragged class blocks, 2-D (batch, class) grid --
    # B=70 -> TM=40, grid_b=2 (last block masked); C=600 -> C_pad=640, TN=512,
    # grid_c=2 (last class block masked).
    B2, C2 = 70, 600
    w2 = jax.random.uniform(keys[3], (hidden, C2), jnp.float32, -bound, bound)
    b2 = jax.random.uniform(keys[4], (C2,), jnp.float32, -bound, bound)
    x2 = jax.random.normal(keys[5], (B2, hidden), jnp.float32)
    out2 = jax.block_until_ready(classify_forward(x2, w2, b2))
    ref2 = x2 @ w2 + b2
    assert out2.shape == (B2, C2)
    assert jnp.allclose(out2, ref2, atol=1e-4, rtol=1e-4)

    # --- case 3: optional bf16 compute path (f32 accumulation) ----------------
    B3, C3 = 16, 10
    w3 = jax.random.uniform(keys[6], (hidden, C3), jnp.float32, -bound, bound)
    b3 = jax.random.uniform(keys[7], (C3,), jnp.float32, -bound, bound)
    x3 = jax.random.normal(keys[8], (B3, hidden), jnp.float32)
    out3 = jax.block_until_ready(
        classify_forward(x3, w3, b3, compute_dtype=jnp.bfloat16))
    ref3 = x3 @ w3 + b3
    assert out3.shape == (B3, C3)
    assert jnp.allclose(out3, ref3, atol=5e-2, rtol=0.0)

    print("KERNEL_OK")
</pallas_src>

<mosaic_0001>
module attributes {stable_mosaic.version = 11 : i64} {
  func.func @_linear_kernel(%arg0: i32, %arg1: i32, %arg2: memref<8x512xf32, #tpu.memory_space<vmem>>, %arg3: memref<512x128xf32, #tpu.memory_space<vmem>>, %arg4: memref<1x128xf32, #tpu.memory_space<vmem>>, %arg5: memref<8x128xf32, #tpu.memory_space<vmem>>) attributes {dimension_semantics = [#tpu.dimension_semantics<parallel>, #tpu.dimension_semantics<parallel>], iteration_bounds = array<i64: 1, 1>, scalar_prefetch = 0 : i64, scratch_operands = 0 : i64, tpu.core_type = #tpu.core_type<tc>, window_params = [{transform_indices = @transform_0, window_bounds = array<i64: 8, 512>}, {transform_indices = @transform_1, window_bounds = array<i64: 512, 128>}, {transform_indices = @transform_2, window_bounds = array<i64: 1, 128>}, {transform_indices = @transform_3, window_bounds = array<i64: 8, 128>}]} {
    %c0 = arith.constant 0 : index
    %c0_0 = arith.constant 0 : index
    %0 = vector.load %arg2[%c0, %c0_0] : memref<8x512xf32, #tpu.memory_space<vmem>>, vector<8x512xf32>
    %c0_1 = arith.constant 0 : index
    %c0_2 = arith.constant 0 : index
    %1 = vector.load %arg3[%c0_1, %c0_2] : memref<512x128xf32, #tpu.memory_space<vmem>>, vector<512x128xf32>
    %cst = arith.constant dense<0.000000e+00> : vector<8x128xf32>
    %2 = tpu.matmul %0, %1, %cst {dimension_numbers = #tpu.dot_dimension_numbers<[1], [0], [0], [1], [0, 0, 1, 1], [], []>} : vector<8x512xf32>, vector<512x128xf32>, vector<8x128xf32> -> vector<8x128xf32>
    %c0_3 = arith.constant 0 : index
    %c0_4 = arith.constant 0 : index
    %3 = vector.load %arg4[%c0_3, %c0_4] : memref<1x128xf32, #tpu.memory_space<vmem>>, vector<1x128xf32>
    %4 = vector.broadcast %3 : vector<1x128xf32> to vector<8x128xf32>
    %5 = arith.addf %2, %4 : vector<8x128xf32>
    %c0_5 = arith.constant 0 : index
    %c0_6 = arith.constant 0 : index
    %6 = vector.load %arg5[%c0_5, %c0_6] : memref<8x128xf32, #tpu.memory_space<vmem>>, vector<8x128xf32>
    tpu.vector_store %arg5[%c0_5, %c0_6], %5 {strides = array<i32>} : memref<8x128xf32, #tpu.memory_space<vmem>>, vector<8x128xf32>,
    return
  }
  func.func @transform_0(%arg0: i32, %arg1: i32) -> (i32, i32) {
    %c0_i32 = arith.constant 0 : i32
    %c0_i32_0 = arith.constant 0 : i32
    return %arg0, %c0_i32 : i32, i32
  }
  func.func @transform_1(%arg0: i32, %arg1: i32) -> (i32, i32) {
    %c0_i32 = arith.constant 0 : i32
    %c0_i32_0 = arith.constant 0 : i32
    return %c0_i32, %arg1 : i32, i32
  }
  func.func @transform_2(%arg0: i32, %arg1: i32) -> (i32, i32) {
    %c0_i32 = arith.constant 0 : i32
    %c0_i32_0 = arith.constant 0 : i32
    return %c0_i32, %arg1 : i32, i32
  }
  func.func @transform_3(%arg0: i32, %arg1: i32) -> (i32, i32) {
    %c0_i32 = arith.constant 0 : i32
    return %arg0, %arg1 : i32, i32
  }
}

</mosaic_0001>

<bundles_post_ra>
// kernel: tpu_custom_call.1
= control target key start
LH: loop header
LB: loop body
LE: loop exit
PB: predicated region body
PF: predicated region fallthrough
CT: control target
= control target key end

     0   :  { %8 = vsyncpa [#allocation3], 0  ;;  %s452_s0 = inlined_call_operand.hbm [shape: f32[8,512], index: 0, kind: input, shape index: {}]   ;;  %s453_s1 = inlined_call_operand.hbm [shape: f32[512,128], index: 1, kind: input, shape index: {}]   ;;  %s454_s2 = inlined_call_operand.vmem [shape: f32[1,128], index: 2, kind: input, shape index: {}]   ;;  %s455_s3 = inlined_call_operand.hbm [shape: f32[8,128], index: 3, kind: output, shape index: {}]  }
   0x1   :  { %9 = vsyncpa [#allocation6], 0 }
   0x2   :  { %10 = vsyncpa [#allocation4], 0  ;;  %s415_s12 = smov [#allocation2]   ;;  %s416_s14 = smov [#allocation5]  }
   0x3   :  { %s17_s13 = sshll.u32 %s415_s12, 4  ;;  %s26_s15 = sshll.u32 %s416_s14, 4  ;;  %s18_s13 = int_to_ptr.vmem [resolvable:$true] %s17_s13  ;;  %s27_s15 = int_to_ptr.vmem [resolvable:$true] %s26_s15 }
   0x4   :  { %s357_s16 = scalar_lea.vmem %s18_s13, 512  ;;  %p362_p1 = scmp.lt.s32.totalorder %s18_s13, %s18_s13 }
   0x5   :  { %p358_p0 = scmp.ne.s32.totalorder %s18_s13, %s357_s16  ;;  %p363_p2 = scmp.lt.s32.totalorder %s357_s16, %s357_s16 }
   0x7   :  { %p364_p3 = por %p363_p2, %p362_p1 }
   0x9   :  { %p365_p4 = pnand %p364_p3, %p358_p0 }
   0xb   :  { %368 = shalt.err (!%p365_p4)
}
   0xc   :  { %20 = dma.hbm_to_vmem [thread:$0]  %s452_s0, 512, %s18_s13, [#allocation3]  }
   0xd   :  { %s377_s19 = scalar_lea.vmem %s27_s15, 8192  ;;  %p382_p6 = scmp.lt.s32.totalorder %s27_s15, %s27_s15 }
   0xe   :  { %p378_p5 = scmp.ne.s32.totalorder %s27_s15, %s377_s19  ;;  %p383_p7 = scmp.lt.s32.totalorder %s377_s19, %s377_s19 }
  0x10   :  { %p384_p8 = por %p383_p7, %p382_p6 }
  0x12   :  { %p385_p9 = pnand %p384_p8, %p378_p5 }
  0x14   :  { %388 = shalt.err (!%p385_p9)
}
  0x15   :  { %s417_s20 = smov 128   ;;  %s418_s21 = smov 8  }
  0x16   :  { %32 = dma.hbm_to_vmem [thread:$0]  %s453_s1, 8192, %s27_s15, [#allocation6], %s417_s20, %s417_s20, %s418_s21  }
  0x17   :  { %409 = dma.done.wait [#allocation3], 512  }
  0x18   :  { %410 = vsyncadd [#allocation3], 4294966784 }
  0x19   :  { %411 = dma.done.wait [#allocation6], 8192  }
  0x1a   :  { %412 = vsyncadd [#allocation6], 4294959104  ;;  %v76_v0 = vld [vmem:[#allocation5 + $0xf8] sm:$0xff]  ;;  %v75_v4 = vld [vmem:[#allocation5 + $0xf0] sm:$0xff]  ;;  %s419_s24 = smov [#allocation7]  }
  0x1b   :  { %v108_v1 = vld [vmem:[#allocation5 + $0x1f8] sm:$0xff]  ;;  %274 = vmatprep.subr.mxu0 %v76_v0  ;;  %v107_v5 = vld [vmem:[#allocation5 + $0x1f0] sm:$0xff]  ;;  %v74_v8 = vld [vmem:[#allocation5 + $0xe8] sm:$0xff]  ;;  %s263_s25 = sshll.u32 %s419_s24, 4  ;;  %s264_s25 = int_to_ptr.vmem [resolvable:$true] %s263_s25 }
  0x1c   :  { %v60_v2 = vld [vmem:[#allocation5 + $0x78] sm:$0xff]  ;;  %309 = vmatprep.subr.mxu1 %v108_v1  ;;  %v59_v6 = vld [vmem:[#allocation5 + $0x70] sm:$0xff]  ;;  %v106_v9 = vld [vmem:[#allocation5 + $0x1e8] sm:$0xff]  ;;  %s389_s26 = scalar_lea.vmem %s264_s25, 128  ;;  %p394_p11 = scmp.lt.s32.totalorder %s264_s25, %s264_s25 }
  0x1d   :  { %v92_v3 = vld [vmem:[#allocation5 + $0x178] sm:$0xff]  ;;  %275 = vmatpush3.msra.mxu0 %v60_v2  ;;  %v91_v7 = vld [vmem:[#allocation5 + $0x170] sm:$0xff]  ;;  %v58_v10 = vld [vmem:[#allocation5 + $0x68] sm:$0xff]  ;;  %p390_p10 = scmp.ne.s32.totalorder %s264_s25, %s389_s26  ;;  %p395_p12 = scmp.lt.s32.totalorder %s389_s26, %s389_s26 }
  0x1e   :  { %310 = vmatpush3.msra.mxu1 %v92_v3  ;;  %276 = vmatprep.subr.mxu0 %v75_v4  ;;  %v90_v11 = vld [vmem:[#allocation5 + $0x168] sm:$0xff]  ;;  %v73_v12 = vld [vmem:[#allocation5 + $0xe0] sm:$0xff]  ;;  %v72_v16 = vld [vmem:[#allocation5 + $0xd8] sm:$0xff] }
  0x1f   :  { %311 = vmatprep.subr.mxu1 %v107_v5  ;;  %277 = vmatpush3.msra.mxu0 %v59_v6  ;;  %v105_v13 = vld [vmem:[#allocation5 + $0x1e0] sm:$0xff]  ;;  %v104_v17 = vld [vmem:[#allocation5 + $0x1d8] sm:$0xff]  ;;  %v71_v20 = vld [vmem:[#allocation5 + $0xd0] sm:$0xff]  ;;  %p396_p13 = por %p395_p12, %p394_p11 }
  0x20   :  { %312 = vmatpush3.msra.mxu1 %v91_v7  ;;  %278 = vmatprep.subr.mxu0 %v74_v8  ;;  %v57_v14 = vld [vmem:[#allocation5 + $0x60] sm:$0xff]  ;;  %v56_v18 = vld [vmem:[#allocation5 + $0x58] sm:$0xff]  ;;  %v103_v21 = vld [vmem:[#allocation5 + $0x1d0] sm:$0xff] }
  0x21   :  { %313 = vmatprep.subr.mxu1 %v106_v9  ;;  %v89_v15 = vld [vmem:[#allocation5 + $0x160] sm:$0xff]  ;;  %279 = vmatpush3.msra.mxu0 %v58_v10  ;;  %v88_v19 = vld [vmem:[#allocation5 + $0x158] sm:$0xff]  ;;  %v55_v22 = vld [vmem:[#allocation5 + $0x50] sm:$0xff]  ;;  %p397_p0 = pnand %p396_p13, %p390_p10 }
  0x22   :  { %314 = vmatpush3.msra.mxu1 %v90_v11  ;;  %280 = vmatprep.subr.mxu0 %v73_v12  ;;  %v87_v23 = vld [vmem:[#allocation5 + $0x150] sm:$0xff]  ;;  %v70_v24 = vld [vmem:[#allocation5 + $0xc8] sm:$0xff]  ;;  %v69_v28 = vld [vmem:[#allocation5 + $0xc0] sm:$0xff] }
  0x23   :  { %315 = vmatprep.subr.mxu1 %v105_v13  ;;  %281 = vmatpush3.msra.mxu0 %v57_v14  ;;  %v102_v25 = vld [vmem:[#allocation5 + $0x1c8] sm:$0xff]  ;;  %v101_v29 = vld [vmem:[#allocation5 + $0x1c0] sm:$0xff]  ;;  %v68_v32 = vld [vmem:[#allocation5 + $0xb8] sm:$0xff] }
  0x24   :  { %316 = vmatpush3.msra.mxu1 %v89_v15  ;;  %282 = vmatprep.subr.mxu0 %v72_v16  ;;  %v54_v26 = vld [vmem:[#allocation5 + $0x48] sm:$0xff]  ;;  %v53_v30 = vld [vmem:[#allocation5 + $0x40] sm:$0xff]  ;;  %v100_v33 = vld [vmem:[#allocation5 + $0x1b8] sm:$0xff] }
  0x25   :  { %317 = vmatprep.subr.mxu1 %v104_v17  ;;  %283 = vmatpush3.msra.mxu0 %v56_v18  ;;  %v86_v27 = vld [vmem:[#allocation5 + $0x148] sm:$0xff]  ;;  %v85_v31 = vld [vmem:[#allocation5 + $0x140] sm:$0xff]  ;;  %v52_v34 = vld [vmem:[#allocation5 + $0x38] sm:$0xff] }
  0x26   :  { %318 = vmatpush3.msra.mxu1 %v88_v19  ;;  %284 = vmatprep.subr.mxu0 %v71_v20  ;;  %v84_v35 = vld [vmem:[#allocation5 + $0x138] sm:$0xff]  ;;  %v67_v36 = vld [vmem:[#allocation5 + $0xb0] sm:$0xff]  ;;  %v66_v40 = vld [vmem:[#allocation5 + $0xa8] sm:$0xff] }
  0x27   :  { %319 = vmatprep.subr.mxu1 %v103_v21  ;;  %285 = vmatpush3.msra.mxu0 %v55_v22  ;;  %v99_v37 = vld [vmem:[#allocation5 + $0x1b0] sm:$0xff]  ;;  %v98_v41 = vld [vmem:[#allocation5 + $0x1a8] sm:$0xff]  ;;  %v65_v44 = vld [vmem:[#allocation5 + $0xa0] sm:$0xff] }
  0x28   :  { %320 = vmatpush3.msra.mxu1 %v87_v23  ;;  %286 = vmatprep.subr.mxu0 %v70_v24  ;;  %v51_v38 = vld [vmem:[#allocation5 + $0x30] sm:$0xff]  ;;  %v50_v42 = vld [vmem:[#allocation5 + $0x28] sm:$0xff]  ;;  %v97_v45 = vld [vmem:[#allocation5 + $0x1a0] sm:$0xff] }
  0x29   :  { %321 = vmatprep.subr.mxu1 %v102_v25  ;;  %287 = vmatpush3.msra.mxu0 %v54_v26  ;;  %v83_v39 = vld [vmem:[#allocation5 + $0x130] sm:$0xff]  ;;  %v82_v43 = vld [vmem:[#allocation5 + $0x128] sm:$0xff]  ;;  %v49_v46 = vld [vmem:[#allocation5 + $0x20] sm:$0xff] }
  0x2a   :  { %322 = vmatpush3.msra.mxu1 %v86_v27  ;;  %288 = vmatprep.subr.mxu0 %v69_v28  ;;  %v81_v47 = vld [vmem:[#allocation5 + $0x120] sm:$0xff]  ;;  %v64_v48 = vld [vmem:[#allocation5 + $0x98] sm:$0xff]  ;;  %v63_v52 = vld [vmem:[#allocation5 + $0x90] sm:$0xff] }
  0x2b   :  { %323 = vmatprep.subr.mxu1 %v101_v29  ;;  %289 = vmatpush3.msra.mxu0 %v53_v30  ;;  %v96_v49 = vld [vmem:[#allocation5 + $0x198] sm:$0xff]  ;;  %v95_v53 = vld [vmem:[#allocation5 + $0x190] sm:$0xff]  ;;  %v62_v56 = vld [vmem:[#allocation5 + $0x88] sm:$0xff] }
  0x2c   :  { %324 = vmatpush3.msra.mxu1 %v85_v31  ;;  %290 = vmatprep.subr.mxu0 %v68_v32  ;;  %v48_v50 = vld [vmem:[#allocation5 + $0x18] sm:$0xff]  ;;  %v47_v54 = vld [vmem:[#allocation5 + $0x10] sm:$0xff]  ;;  %v94_v57 = vld [vmem:[#allocation5 + $0x188] sm:$0xff] }
  0x2d   :  { %325 = vmatprep.subr.mxu1 %v100_v33  ;;  %291 = vmatpush3.msra.mxu0 %v52_v34  ;;  %v80_v51 = vld [vmem:[#allocation5 + $0x118] sm:$0xff]  ;;  %v79_v55 = vld [vmem:[#allocation5 + $0x110] sm:$0xff]  ;;  %v46_v58 = vld [vmem:[#allocation5 + $0x8] sm:$0xff] }
  0x2e   :  { %326 = vmatpush3.msra.mxu1 %v84_v35  ;;  %292 = vmatprep.subr.mxu0 %v67_v36  ;;  %v78_v59 = vld [vmem:[#allocation5 + $0x108] sm:$0xff]  ;;  %v61_v60 = vld [vmem:[#allocation5 + $0x80] sm:$0xff]  ;;  %v44_v1 = vld [vmem:[#allocation2 + $0x18] sm:$0xff] }
  0x2f   :  { %327 = vmatprep.subr.mxu1 %v99_v37  ;;  %293 = vmatpush3.msra.mxu0 %v51_v38  ;;  %v93_v61 = vld [vmem:[#allocation5 + $0x180] sm:$0xff]  ;;  %v42_v63 = vld [vmem:[#allocation2 + $0x8] sm:$0xff]  ;;  %v43_v3 = vld [vmem:[#allocation2 + $0x10] sm:$0xff] }
  0x30   :  { %328 = vmatpush3.msra.mxu1 %v83_v39  ;;  %294 = vmatprep.subr.mxu0 %v66_v40  ;;  %v45_v62 = vld [vmem:[#allocation5] sm:$0xff] }
  0x31   :  { %329 = vmatprep.subr.mxu1 %v98_v41  ;;  %295 = vmatpush3.msra.mxu0 %v50_v42  ;;  %v77_v0 = vld [vmem:[#allocation5 + $0x100] sm:$0xff] }
  0x32   :  { %330 = vmatpush3.msra.mxu1 %v82_v43  ;;  %296 = vmatprep.subr.mxu0 %v65_v44  ;;  %v41_v2 = vld [vmem:[#allocation2] sm:$0xff] }
  0x33   :  { %331 = vmatprep.subr.mxu1 %v97_v45  ;;  %297 = vmatpush3.msra.mxu0 %v49_v46  ;;  %v273_v6 = vld [vmem:[%s454_s2] ss:$0 sm:$0xff] }
  0x34   :  { %332 = vmatpush3.msra.mxu1 %v81_v47  ;;  %298 = vmatprep.subr.mxu0 %v64_v48 }
  0x35   :  { %333 = vmatprep.subr.mxu1 %v96_v49  ;;  %299 = vmatpush3.msra.mxu0 %v48_v50 }
  0x36   :  { %334 = vmatpush3.msra.mxu1 %v80_v51  ;;  %300 = vmatprep.subr.mxu0 %v63_v52 }
  0x37   :  { %335 = vmatprep.subr.mxu1 %v95_v53  ;;  %301 = vmatpush3.msra.mxu0 %v47_v54 }
  0x38   :  { %336 = vmatpush3.msra.mxu1 %v79_v55  ;;  %302 = vmatprep.subr.mxu0 %v62_v56 }
  0x39   :  { %337 = vmatprep.subr.mxu1 %v94_v57  ;;  %303 = vmatpush3.msra.mxu0 %v46_v58 }
  0x3a   :  { %338 = vmatpush3.msra.mxu1 %v78_v59  ;;  %304 = vmatprep.subr.mxu0 %v61_v60 }
  0x3b   :  { %339 = vmatprep.subr.mxu1 %v93_v61  ;;  %305 = vmatpush3.msra.mxu0 %v45_v62 }
  0x3c   :  { %180 = vmatprep.mubr.f32.mxu0 %v42_v63  ;;  %340 = vmatpush3.msra.mxu1 %v77_v0 }
  0x3d   :  { %250 = vmatprep.mubr.f32.mxu1 %v44_v1  ;;  %181 = vmatmul.mubr.f32.vlgmr.msra.gmra.mxu0 %v41_v2 }
  0x3e   :  { %251 = vmatmul.mubr.f32.vlgmr.msra.gmra.mxu1 %v43_v3 }
  0xfd   :  { %v306_v4 = vpop.f32.mrf.mxu0 }
  0xfe   :  { %v341_v5 = vpop.f32.mrf.mxu1 }
  0xff   :  { %v307_v7 = vpop.f32.mrf.mxu0 }
 0x100   :  { %v342_v8 = vpop.f32.mrf.mxu1  ;;  %v308_v9 = vadd.f32 %v307_v7, %v306_v4 }
 0x101   :  { %v343_v11 = vadd.f32 %v342_v8, %v341_v5 }
 0x102   :  { %v183_v10 = vadd.f32 %v308_v9, %v273_v6 }
 0x104   :  { %v253_v12 = vadd.f32 %v343_v11, %v183_v10 }
 0x106   :  { %256 = vst [vmem:[#allocation7] sm:$0xff] %v253_v12 }
 0x107   :  { %400 = shalt.err (!%p397_p0)
}
 0x108   :  { %266 = dma.vmem_to_hbm [thread:$0]  %s264_s25, 128, %s455_s3, [#allocation4]  }
 0x109   :  { %413 = dma.done.wait [#allocation4], 128  }
 0x10a   :  { %414 = vsyncadd [#allocation4], 4294967168 }
 0x10b   :  { %270 = vsyncpa [#allocation3], 1 }
 0x10c   :  { %271 = vsyncpa [#allocation6], 1 }
 0x10d   :  { %272 = vsyncpa [#allocation4], 1 }

</bundles_post_ra>
